<compile_context>
chip_gen: v6e
topology: v6e:2x2x1
jax: 0.10.0
libtpu: 0.0.40
codegen_flags: <defaults>
</compile_context>

<pallas_src>
import math

import jax
import jax.numpy as jnp
from jax.experimental import pallas as pl
from jax.experimental.pallas import tpu as pltpu


def _round_up(n, m):
    return ((n + m - 1) // m) * m


def _mlp_kernel(x_ref, w1_ref, b1_ref, w2_ref, b2_ref, o_ref):
    # Full f32 path: both dots accumulate in f32 on the MXU; elementwise on VPU.
    h = jnp.dot(x_ref[...], w1_ref[...], preferred_element_type=jnp.float32) + b1_ref[...]
    h = jnp.maximum(h, 0.0)
    out = jnp.dot(h, w2_ref[...], preferred_element_type=jnp.float32) + b2_ref[...]
    o_ref[...] = out.astype(o_ref.dtype)           # narrow (tb, out_dim) store


def _choose_batch_tile(B, block_b):
    """Pick (tb, b_pad). Prefer no padding; give v7x >=2 grid steps when cheap."""
    if B <= block_b:
        if B >= 16 and B % 16 == 0:
            return B // 2, B        # two grid steps, each a multiple of 8 sublanes
        return B, B                 # single full-extent tile (no (8,128) constraint)
    tb = _round_up(min(block_b, B), 8)
    return tb, _round_up(B, tb)


def network_ldu_forward(x, w1, b1, w2, b2, *, block_b=2048):
    """x: (B, input_size) f32; w1: (in, hidden); w2: (hidden, out). Returns (B, out) f32."""
    B, in_dim = x.shape
    hidden = w1.shape[1]
    out_dim = w2.shape[1]

    tb, b_pad = _choose_batch_tile(B, block_b)
    x_p = x if b_pad == B else jnp.pad(x, ((0, b_pad - B), (0, 0)))

    b1_2d = b1.reshape(1, hidden).astype(jnp.float32)
    b2_2d = b2.reshape(1, out_dim).astype(jnp.float32)

    grid = (b_pad // tb,)

    flops = 2 * b_pad * (in_dim * hidden + hidden * out_dim)
    bytes_accessed = (
        4 * b_pad * in_dim                     # x read
        + 4 * (in_dim * hidden + hidden * out_dim + hidden + out_dim)  # params
        + 4 * b_pad * out_dim)                 # output write

    out = pl.pallas_call(
        _mlp_kernel,
        out_shape=jax.ShapeDtypeStruct((b_pad, out_dim), jnp.float32),
        grid=grid,
        in_specs=[
            pl.BlockSpec((tb, in_dim), lambda i: (i, 0)),        # x: batch-tiled
            pl.BlockSpec((in_dim, hidden), lambda i: (0, 0)),    # w1: resident
            pl.BlockSpec((1, hidden), lambda i: (0, 0)),         # b1: resident
            pl.BlockSpec((hidden, out_dim), lambda i: (0, 0)),   # w2: resident
            pl.BlockSpec((1, out_dim), lambda i: (0, 0)),        # b2: resident
        ],
        out_specs=pl.BlockSpec((tb, out_dim), lambda i: (i, 0)),
        compiler_params=pltpu.CompilerParams(
            dimension_semantics=("parallel",),   # shard batch tiles across TCs (v7x)
        ),
        cost_estimate=pl.CostEstimate(
            flops=flops, transcendentals=0, bytes_accessed=bytes_accessed),
    )(x_p, w1, b1_2d, w2, b2_2d)

    # NOTE: padded rows compute ReLU(b1)@w2 + b2 (not zeros); the batch slice
    # below is what keeps the result correct — do not hand out `out` unsliced.
    return out if b_pad == B else out[:B]


def init_params(key, input_size, hidden_size, output_size):
    """Deterministic init mimicking nn.Linear's U(-1/sqrt(fan_in), 1/sqrt(fan_in))."""
    k1, k2, k3, k4 = jax.random.split(key, 4)
    bound1 = 1.0 / math.sqrt(input_size)
    bound2 = 1.0 / math.sqrt(hidden_size)
    # Stored as (in, out) — already transposed relative to PyTorch's (out, in).
    w1 = jax.random.uniform(k1, (input_size, hidden_size), jnp.float32, -bound1, bound1)
    b1 = jax.random.uniform(k2, (hidden_size,), jnp.float32, -bound1, bound1)
    w2 = jax.random.uniform(k3, (hidden_size, output_size + 1), jnp.float32, -bound2, bound2)
    b2 = jax.random.uniform(k4, (output_size + 1,), jnp.float32, -bound2, bound2)
    return w1, b1, w2, b2


def _ref_forward(x, w1, b1, w2, b2):
    return jnp.maximum(x @ w1 + b1, 0.0) @ w2 + b2


if __name__ == "__main__":
    # arg-equivalents (small synthetic sizes consistent with the module)
    input_size = 32
    hidden_size = 32
    output_size = 4          # l3 produces output_size + 1 = 5 logits
    batch = 8

    key = jax.random.PRNGKey(0)
    kx, kp = jax.random.split(key)
    x = jax.random.normal(kx, (batch, input_size), jnp.float32)
    w1, b1, w2, b2 = init_params(kp, input_size, hidden_size, output_size)

    out = jax.block_until_ready(network_ldu_forward(x, w1, b1, w2, b2))
    assert out.shape == (batch, output_size + 1)
    assert jnp.allclose(out, _ref_forward(x, w1, b1, w2, b2), atol=2e-2, rtol=2e-2), \
        "mismatch vs f32 reference (batch=8)"

    # Batch divisible by 16: exercises the 2-step megacore split with no padding.
    batch2 = 32
    x2 = jax.random.normal(jax.random.PRNGKey(1), (batch2, input_size), jnp.float32)
    out2 = jax.block_until_ready(network_ldu_forward(x2, w1, b1, w2, b2))
    assert out2.shape == (batch2, output_size + 1)
    assert jnp.allclose(out2, _ref_forward(x2, w1, b1, w2, b2), atol=2e-2, rtol=2e-2), \
        "mismatch vs f32 reference (batch=32)"

    # Ragged batch: exercises batch padding + a multi-step grid.
    batch3 = 50
    x3 = jax.random.normal(jax.random.PRNGKey(2), (batch3, input_size), jnp.float32)
    out3 = jax.block_until_ready(network_ldu_forward(x3, w1, b1, w2, b2, block_b=16))
    assert out3.shape == (batch3, output_size + 1)
    assert jnp.allclose(out3, _ref_forward(x3, w1, b1, w2, b2), atol=2e-2, rtol=2e-2), \
        "mismatch vs f32 reference (batch=50, ragged)"

    print("KERNEL_OK")
</pallas_src>

<mosaic_0001>
module attributes {stable_mosaic.version = 11 : i64} {
  func.func @_mlp_kernel(%arg0: i32, %arg1: memref<8x32xf32, #tpu.memory_space<vmem>>, %arg2: memref<32x32xf32, #tpu.memory_space<vmem>>, %arg3: memref<1x32xf32, #tpu.memory_space<vmem>>, %arg4: memref<32x5xf32, #tpu.memory_space<vmem>>, %arg5: memref<1x5xf32, #tpu.memory_space<vmem>>, %arg6: memref<8x5xf32, #tpu.memory_space<vmem>>) attributes {dimension_semantics = [#tpu.dimension_semantics<parallel>], iteration_bounds = array<i64: 1>, scalar_prefetch = 0 : i64, scratch_operands = 0 : i64, tpu.core_type = #tpu.core_type<tc>, window_params = [{transform_indices = @transform_0, window_bounds = array<i64: 8, 32>}, {pipeline_mode = #tpu.pipeline_mode<synchronous>, transform_indices = @transform_1, window_bounds = array<i64: 32, 32>}, {pipeline_mode = #tpu.pipeline_mode<synchronous>, transform_indices = @transform_2, window_bounds = array<i64: 1, 32>}, {pipeline_mode = #tpu.pipeline_mode<synchronous>, transform_indices = @transform_3, window_bounds = array<i64: 32, 5>}, {pipeline_mode = #tpu.pipeline_mode<synchronous>, transform_indices = @transform_4, window_bounds = array<i64: 1, 5>}, {transform_indices = @transform_5, window_bounds = array<i64: 8, 5>}]} {
    %c0 = arith.constant 0 : index
    %c0_0 = arith.constant 0 : index
    %0 = vector.load %arg1[%c0, %c0_0] : memref<8x32xf32, #tpu.memory_space<vmem>>, vector<8x32xf32>
    %c0_1 = arith.constant 0 : index
    %c0_2 = arith.constant 0 : index
    %1 = vector.load %arg2[%c0_1, %c0_2] : memref<32x32xf32, #tpu.memory_space<vmem>>, vector<32x32xf32>
    %cst = arith.constant dense<0.000000e+00> : vector<8x32xf32>
    %2 = tpu.matmul %0, %1, %cst {dimension_numbers = #tpu.dot_dimension_numbers<[1], [0], [0], [1], [0, 0, 1, 1], [], []>} : vector<8x32xf32>, vector<32x32xf32>, vector<8x32xf32> -> vector<8x32xf32>
    %c0_3 = arith.constant 0 : index
    %c0_4 = arith.constant 0 : index
    %3 = vector.load %arg3[%c0_3, %c0_4] : memref<1x32xf32, #tpu.memory_space<vmem>>, vector<1x32xf32>
    %4 = vector.broadcast %3 : vector<1x32xf32> to vector<8x32xf32>
    %5 = arith.addf %2, %4 : vector<8x32xf32>
    %cst_5 = arith.constant 0.000000e+00 : f32
    %6 = vector.broadcast %cst_5 : f32 to vector<8x32xf32>
    %7 = arith.maximumf %5, %6 : vector<8x32xf32>
    %c0_6 = arith.constant 0 : index
    %c0_7 = arith.constant 0 : index
    %8 = vector.load %arg4[%c0_6, %c0_7] : memref<32x5xf32, #tpu.memory_space<vmem>>, vector<32x5xf32>
    %cst_8 = arith.constant dense<0.000000e+00> : vector<8x5xf32>
    %9 = tpu.matmul %7, %8, %cst_8 {dimension_numbers = #tpu.dot_dimension_numbers<[1], [0], [0], [1], [0, 0, 1, 1], [], []>} : vector<8x32xf32>, vector<32x5xf32>, vector<8x5xf32> -> vector<8x5xf32>
    %c0_9 = arith.constant 0 : index
    %c0_10 = arith.constant 0 : index
    %10 = vector.load %arg5[%c0_9, %c0_10] : memref<1x5xf32, #tpu.memory_space<vmem>>, vector<1x5xf32>
    %11 = vector.broadcast %10 : vector<1x5xf32> to vector<8x5xf32>
    %12 = arith.addf %9, %11 : vector<8x5xf32>
    %c0_11 = arith.constant 0 : index
    %c0_12 = arith.constant 0 : index
    %13 = vector.load %arg6[%c0_11, %c0_12] : memref<8x5xf32, #tpu.memory_space<vmem>>, vector<8x5xf32>
    tpu.vector_store %arg6[%c0_11, %c0_12], %12 {strides = array<i32>} : memref<8x5xf32, #tpu.memory_space<vmem>>, vector<8x5xf32>,
    return
  }
  func.func @transform_0(%arg0: i32) -> (i32, i32) {
    %c0_i32 = arith.constant 0 : i32
    %c0_i32_0 = arith.constant 0 : i32
    return %arg0, %c0_i32 : i32, i32
  }
  func.func @transform_1(%arg0: i32) -> (i32, i32) {
    %c0_i32 = arith.constant 0 : i32
    %c0_i32_0 = arith.constant 0 : i32
    %c0_i32_1 = arith.constant 0 : i32
    return %c0_i32, %c0_i32_0 : i32, i32
  }
  func.func @transform_2(%arg0: i32) -> (i32, i32) {
    %c0_i32 = arith.constant 0 : i32
    %c0_i32_0 = arith.constant 0 : i32
    %c0_i32_1 = arith.constant 0 : i32
    return %c0_i32, %c0_i32_0 : i32, i32
  }
  func.func @transform_3(%arg0: i32) -> (i32, i32) {
    %c0_i32 = arith.constant 0 : i32
    %c0_i32_0 = arith.constant 0 : i32
    %c0_i32_1 = arith.constant 0 : i32
    return %c0_i32, %c0_i32_0 : i32, i32
  }
  func.func @transform_4(%arg0: i32) -> (i32, i32) {
    %c0_i32 = arith.constant 0 : i32
    %c0_i32_0 = arith.constant 0 : i32
    %c0_i32_1 = arith.constant 0 : i32
    return %c0_i32, %c0_i32_0 : i32, i32
  }
  func.func @transform_5(%arg0: i32) -> (i32, i32) {
    %c0_i32 = arith.constant 0 : i32
    %c0_i32_0 = arith.constant 0 : i32
    return %arg0, %c0_i32 : i32, i32
  }
}

</mosaic_0001>

<bundles_post_ra>
// kernel: tpu_custom_call.1
= control target key start
LH: loop header
LB: loop body
LE: loop exit
PB: predicated region body
PF: predicated region fallthrough
CT: control target
= control target key end

     0   :  { %v269_v1 = vmov 0.0   ;;  %vm270_vm0 = vmmov 0   ;;  %s340_s0 = inlined_call_operand.vmem [shape: f32[8,32], index: 0, kind: input, shape index: {}]   ;;  %s341_s1 = inlined_call_operand.vmem [shape: f32[32,32], index: 1, kind: input, shape index: {}]   ;;  %s342_s2 = inlined_call_operand.vmem [shape: f32[1,32], index: 2, kind: input, shape index: {}]   ;;  %s343_s3 = inlined_call_operand.vmem [shape: f32[32,5], index: 3, kind: input, shape index: {}]   ;;  %s344_s4 = inlined_call_operand.vmem [shape: f32[1,5], index: 4, kind: input, shape index: {}]   ;;  %s345_s5 = inlined_call_operand.hbm [shape: f32[8,5], index: 5, kind: output, shape index: {}]  }
   0x1   :  { %v25_v0 = vld [vmem:[%s341_s1 + $0x18] sm:$0xff]  ;;  %222 = vmatprep.subr.mxu0 %v269_v1  ;;  %v24_v2 = vld [vmem:[%s341_s1 + $0x10] sm:$0xff]  ;;  %230 = vmatprep.mubr.msk.f32.mxu0 %vm270_vm0, %v269_v1 }
   0x2   :  { %v111_v3 = vld [vmem:[%s343_s3 + $0x18] sm:$0xff]  ;;  %223 = vmatpush3.msra.mxu0 %v25_v0  ;;  %233 = vmatprep.subr.mxu1 %v269_v1 }
   0x3   :  { %10 = vsyncpa [#allocation3], 0  ;;  %224 = vmatprep.subr.mxu0 %v269_v1  ;;  %v23_v4 = vld [vmem:[%s341_s1 + $0x8] sm:$0xff]  ;;  %234 = vmatpush3.msra.mxu1 %v111_v3  ;;  %v22_v5 = vld [vmem:[%s341_s1] sm:$0xff]  ;;  %vm33_vm1 = vcmask 261120   ;;  %s271_s13 = smov [#allocation2]  }
   0x4   :  { %225 = vmatpush3.msra.mxu0 %v24_v2  ;;  %235 = vmatprep.subr.mxu1 %v269_v1  ;;  %v21_v6 = vld [vmem:[%s340_s0] sm:$0xff]  ;;  %v110_v7 = vld [vmem:[%s343_s3 + $0x10] sm:$0xff]  ;;  %v109_v8 = vld [vmem:[%s343_s3 + $0x8] sm:$0xff]  ;;  %s200_s14 = sshll.u32 %s271_s13, 4  ;;  %vm192_vm2 = vcmask 39936   ;;  %s201_s14 = int_to_ptr.vmem [resolvable:$true] %s200_s14 }
   0x5   :  { %226 = vmatprep.subr.mxu0 %v269_v1  ;;  %241 = vmatprep.mubr.msk.f32.mxu1 %vm270_vm0, %v269_v1  ;;  %v108_v9 = vld [vmem:[%s343_s3] sm:$0xff]  ;;  %s247_s3 = scalar_lea.vmem %s201_s14, 128  ;;  %p252_p1 = scmp.lt.s32.totalorder %s201_s14, %s201_s14 }
   0x6   :  { %227 = vmatpush3.msra.mxu0 %v23_v4  ;;  %236 = vmatpush3.msra.mxu1 %v110_v7  ;;  %v208_v10 = vld [vmem:[%s342_s2] ss:$0 sm:$0xff]  ;;  %p248_p0 = scmp.ne.s32.totalorder %s201_s14, %s247_s3  ;;  %p253_p2 = scmp.lt.s32.totalorder %s247_s3, %s247_s3 }
   0x7   :  { %228 = vmatprep.subr.mxu0 %v269_v1  ;;  %237 = vmatprep.subr.mxu1 %v269_v1  ;;  %v210_v15 = vld [vmem:[%s344_s4] ss:$0 sm:$0xff] }
   0x8   :  { %229 = vmatpush3.msra.mxu0 %v22_v5  ;;  %238 = vmatpush3.msra.mxu1 %v109_v8  ;;  %p254_p3 = por %p253_p2, %p252_p1 }
   0x9   :  { %231 = vmatmul.mubr.msk.f32.vlgmr.msra.gmra.mxu0 %vm33_vm1, %v21_v6  ;;  %239 = vmatprep.subr.mxu1 %v269_v1 }
   0xa   :  { %240 = vmatpush3.msra.mxu1 %v108_v9  ;;  %p255_p4 = pnand %p254_p3, %p248_p0 }
  0xc9   :  { %v103_v11 = vpop.f32.mrf.mxu0 }
  0xca   :  { %v104_v12 = vadd.f32 %v208_v10, %v103_v11 }
  0xcb   :  { %v232_v13 = vpop.f32.mrf.mxu0 }
  0xcc   :  { %v107_v14 = vmax.f32 %v104_v12, 0.0 }
  0xce   :  { %242 = vmatmul.mubr.msk.f32.vlgmr.msra.gmra.mxu1 %vm33_vm1, %v107_v14 }
 0x18e   :  { %v188_v16 = vpop.f32.mrf.mxu1 }
 0x18f   :  { %v189_v17 = vadd.f32 %v210_v15, %v188_v16 }
 0x190   :  { %v243_v18 = vpop.f32.mrf.mxu1 }
 0x191   :  { %193 = vst.msk [vmem:[#allocation2] sm:$0xff] %vm192_vm2, %v189_v17 }
 0x192   :  { %258 = shalt.err (!%p255_p4)
}
 0x193   :  { %203 = dma.vmem_to_hbm [thread:$0]  %s201_s14, 128, %s345_s5, [#allocation3]  }
 0x194   :  { %267 = dma.done.wait [#allocation3], 128  }
 0x195   :  { %268 = vsyncadd [#allocation3], 4294967168 }
 0x196   :  { %207 = vsyncpa [#allocation3], 1 }

</bundles_post_ra>
